<compile_context>
chip_gen: v5e
topology: v5e:2x2
jax: 0.10.0
libtpu: 0.0.40
codegen_flags: <defaults>
</compile_context>

<pallas_src>
import jax
import jax.numpy as jnp
from jax.experimental import pallas as pl
from jax.experimental.pallas import tpu as pltpu

LN_EPS = 1e-12  # BERT/ALBERT LayerNorm epsilon


def _embed_proj_ln_kernel(x_ref, w_ref, tt_ref, tok_tab_ref, pos_ref,
                          gamma_ref, beta_ref, o_ref):
    # x_ref:       (1, TS, E)  gathered word embeddings (compute dtype)
    # w_ref:       (E, H)      projection weight (PyTorch weight.T), resident across grid
    # tt_ref:      (1, TS, 1)  int32 token-type ids
    # tok_tab_ref: (T, H)      token-type embedding table (T tiny; zero dummy if absent)
    # pos_ref:     (1, TS, H)  position-embedding rows for this seq tile
    # gamma_ref:   (1, H)      LayerNorm weight
    # beta_ref:    (1, H)      LayerNorm bias
    # o_ref:       (1, TS, H)  output
    x = x_ref[0]                                                      # (TS, E)
    y = jnp.dot(x, w_ref[...], preferred_element_type=jnp.float32)   # (TS, H) f32 acc
    y = y + pos_ref[0].astype(jnp.float32)

    # Token-type add: unrolled select-add over the tiny static table (pure VPU work).
    tt = tt_ref[0]                                                    # (TS, 1) int32
    for t in range(tok_tab_ref.shape[0]):
        mask = (tt == t).astype(jnp.float32)                          # (TS, 1)
        y = y + mask * tok_tab_ref[t:t + 1, :].astype(jnp.float32)    # (TS, H)

    # Fused single-pass LayerNorm over the hidden (lane) dimension.
    h = jnp.float32(y.shape[-1])
    s1 = jnp.sum(y, axis=-1, keepdims=True)
    s2 = jnp.sum(y * y, axis=-1, keepdims=True)
    mean = s1 / h
    var = s2 / h - mean * mean
    inv = jax.lax.rsqrt(var + LN_EPS)
    out = (y - mean) * inv
    out = out * gamma_ref[...].astype(jnp.float32) + beta_ref[...].astype(jnp.float32)
    o_ref[0] = out.astype(o_ref.dtype)


def _pick_seq_tile(seq_len, max_tile=512):
    """Largest power-of-two tile (<= max_tile, >= 8) dividing seq_len, else full seq."""
    for cand in (1024, 512, 256, 128, 64, 32, 16, 8):
        if cand <= max_tile and seq_len % cand == 0:
            return cand
    return seq_len


def projection_embeddings_forward(params, input_ids, token_type_ids=None,
                                  position_ids=None, *,
                                  compute_dtype=jnp.bfloat16,
                                  out_dtype=jnp.float32,
                                  max_seq_tile=512):
    """Glue gathers in plain JAX; projection + adds + LayerNorm fused in one Pallas kernel."""
    B, S = input_ids.shape
    word_emb = params["word_embeddings"]        # (V, E)
    proj_w = params["projection_w"]             # (E, H)  == PyTorch weight.T
    tok_emb = params["token_type_embeddings"]   # (T, H) or None
    pos_emb = params["position_embeddings"]     # (P, H)
    gamma = params["ln_gamma"].reshape(1, -1).astype(jnp.float32)
    beta = params["ln_beta"].reshape(1, -1).astype(jnp.float32)

    E = word_emb.shape[1]
    H = proj_w.shape[1]
    N = B * S

    TS = _pick_seq_tile(S, max_seq_tile)   # multiple of 8 (or full S); divides S exactly
    n_s_tiles = S // TS

    # --- glue: word-embedding gather (plain JAX), streamed in compute dtype ---
    x = jnp.take(word_emb, input_ids.reshape(-1), axis=0)
    x = x.reshape(B, S, E).astype(compute_dtype)
    w = proj_w.astype(compute_dtype)

    # Token-type ids + table (dummy zero table when the module has no token_type_embeddings).
    if tok_emb is None:
        tok_tab = jnp.zeros((1, H), compute_dtype)
        tt_ids = jnp.zeros((B, S, 1), jnp.int32)
    else:
        tok_tab = tok_emb.astype(compute_dtype)
        if token_type_ids is None:
            token_type_ids = jnp.zeros_like(input_ids)
        tt_ids = token_type_ids.reshape(B, S, 1).astype(jnp.int32)

    # Position embeddings: default (arange) path streams the (S, H) table rows directly
    # per seq tile (no (N, H) materialization); custom position_ids fall back to a gather.
    if position_ids is None:
        pos_src = pos_emb[:S].reshape(1, S, H).astype(compute_dtype)
        pos_index_map = lambda b, s: (0, s, 0)
    else:
        pos_src = jnp.take(pos_emb, position_ids.reshape(-1), axis=0)
        pos_src = pos_src.reshape(B, S, H).astype(compute_dtype)
        pos_index_map = lambda b, s: (b, s, 0)

    itemsize = jnp.dtype(compute_dtype).itemsize
    cost = pl.CostEstimate(
        flops=2 * N * E * H + 2 * N * H,
        transcendentals=N,
        bytes_accessed=(x.size + w.size + pos_src.size + tok_tab.size) * itemsize
        + tt_ids.size * 4
        + N * H * jnp.dtype(out_dtype).itemsize,
    )

    out = pl.pallas_call(
        _embed_proj_ln_kernel,
        out_shape=jax.ShapeDtypeStruct((B, S, H), out_dtype),
        grid_spec=pltpu.PrefetchScalarGridSpec(
            num_scalar_prefetch=0,
            grid=(B, n_s_tiles),
            in_specs=[
                pl.BlockSpec((1, TS, E), lambda b, s: (b, s, 0)),   # word embeddings
                pl.BlockSpec((E, H), lambda b, s: (0, 0)),          # projection W (resident)
                pl.BlockSpec((1, TS, 1), lambda b, s: (b, s, 0)),   # token-type ids
                pl.BlockSpec(tok_tab.shape, lambda b, s: (0, 0)),   # token-type table (resident)
                pl.BlockSpec((1, TS, H), pos_index_map),            # position rows
                pl.BlockSpec((1, H), lambda b, s: (0, 0)),          # LN gamma
                pl.BlockSpec((1, H), lambda b, s: (0, 0)),          # LN beta
            ],
            out_specs=pl.BlockSpec((1, TS, H), lambda b, s: (b, s, 0)),
        ),
        compiler_params=pltpu.CompilerParams(
            dimension_semantics=("parallel", "parallel"),
        ),
        cost_estimate=cost,
    )(x, w, tt_ids, tok_tab, pos_src, gamma, beta)

    # TODO(synk): Dropout is identity at inference (eval mode); training-mode stochastic
    # dropout is not implemented here.
    return out


def make_params(key, vocab_size, embedding_size, hidden_size, type_vocab_size,
                max_position_embeddings, pad_idx=0):
    ks = jax.random.split(key, 4)
    word = jax.random.normal(ks[0], (vocab_size, embedding_size), jnp.float32) * 0.02
    word = word.at[pad_idx].set(0.0)  # padding_idx row is zero in nn.Embedding
    proj_w = jax.random.normal(ks[1], (embedding_size, hidden_size), jnp.float32) * 0.02
    tok = (jax.random.normal(ks[2], (type_vocab_size, hidden_size), jnp.float32) * 0.02
           if type_vocab_size > 0 else None)
    pos = jax.random.normal(ks[3], (max_position_embeddings, hidden_size), jnp.float32) * 0.02
    return {
        "word_embeddings": word,
        "projection_w": proj_w,
        "token_type_embeddings": tok,
        "position_embeddings": pos,
        "ln_gamma": jnp.ones((hidden_size,), jnp.float32),
        "ln_beta": jnp.zeros((hidden_size,), jnp.float32),
    }


def _reference(params, input_ids, token_type_ids, position_ids):
    """Pure-JAX f32 reference for sanity checking."""
    B, S = input_ids.shape
    e = jnp.take(params["word_embeddings"], input_ids.reshape(-1), axis=0)
    h = e @ params["projection_w"]
    h = h + jnp.take(params["token_type_embeddings"], token_type_ids.reshape(-1), axis=0)
    h = h + jnp.take(params["position_embeddings"], position_ids.reshape(-1), axis=0)
    mean = h.mean(-1, keepdims=True)
    var = ((h - mean) ** 2).mean(-1, keepdims=True)
    out = (h - mean) * jax.lax.rsqrt(var + LN_EPS)
    out = out * params["ln_gamma"] + params["ln_beta"]
    H = params["projection_w"].shape[1]
    return out.reshape(B, S, H)


if __name__ == "__main__":
    # Small config consistent with the module's forward.
    B, S = 2, 8
    vocab_size = 32
    embedding_size = 16
    hidden_size = 32
    type_vocab_size = 2
    max_position_embeddings = 16

    key = jax.random.PRNGKey(0)
    pkey, ikey, tkey = jax.random.split(key, 3)
    params = make_params(pkey, vocab_size, embedding_size, hidden_size,
                         type_vocab_size, max_position_embeddings)

    input_ids = jax.random.randint(ikey, (B, S), 0, vocab_size, dtype=jnp.int32)
    token_type_ids = jax.random.randint(tkey, (B, S), 0, type_vocab_size, dtype=jnp.int32)
    pos_ids = jnp.broadcast_to(jnp.arange(S, dtype=jnp.int32)[None, :], (B, S))
    ref = _reference(params, input_ids, token_type_ids, pos_ids)

    # f32 streaming path: tight check against the reference.
    out_f32 = projection_embeddings_forward(params, input_ids, token_type_ids,
                                            compute_dtype=jnp.float32)
    out_f32 = jax.block_until_ready(out_f32)
    assert out_f32.shape == (B, S, hidden_size)
    assert jnp.allclose(out_f32, ref, atol=1e-4, rtol=1e-4), "f32 path mismatch vs reference"

    # bf16 streaming path (HBM-traffic-optimized; f32 accumulation/LayerNorm): loose check.
    out_bf16 = projection_embeddings_forward(params, input_ids, token_type_ids,
                                             compute_dtype=jnp.bfloat16)
    out_bf16 = jax.block_until_ready(out_bf16)
    assert out_bf16.shape == (B, S, hidden_size)
    assert jnp.allclose(out_bf16, ref, atol=5e-2, rtol=5e-2), "bf16 path mismatch vs reference"

    print("KERNEL_OK")
</pallas_src>

<mosaic_0001>
module attributes {stable_mosaic.version = 11 : i64} {
  func.func @_embed_proj_ln_kernel(%arg0: i32, %arg1: i32, %arg2: memref<1x8x16xf32, #tpu.memory_space<vmem>>, %arg3: memref<16x32xf32, #tpu.memory_space<vmem>>, %arg4: memref<1x8x1xi32, #tpu.memory_space<vmem>>, %arg5: memref<2x32xf32, #tpu.memory_space<vmem>>, %arg6: memref<1x8x32xf32, #tpu.memory_space<vmem>>, %arg7: memref<1x32xf32, #tpu.memory_space<vmem>>, %arg8: memref<1x32xf32, #tpu.memory_space<vmem>>, %arg9: memref<1x8x32xf32, #tpu.memory_space<vmem>>) attributes {dimension_semantics = [#tpu.dimension_semantics<parallel>, #tpu.dimension_semantics<parallel>], iteration_bounds = array<i64: 2, 1>, scalar_prefetch = 0 : i64, scratch_operands = 0 : i64, tpu.core_type = #tpu.core_type<tc>, window_params = [{transform_indices = @transform_0, window_bounds = array<i64: 1, 8, 16>}, {pipeline_mode = #tpu.pipeline_mode<synchronous>, transform_indices = @transform_1, window_bounds = array<i64: 16, 32>}, {transform_indices = @transform_2, window_bounds = array<i64: 1, 8, 1>}, {pipeline_mode = #tpu.pipeline_mode<synchronous>, transform_indices = @transform_3, window_bounds = array<i64: 2, 32>}, {transform_indices = @transform_4, window_bounds = array<i64: 1, 8, 32>}, {pipeline_mode = #tpu.pipeline_mode<synchronous>, transform_indices = @transform_5, window_bounds = array<i64: 1, 32>}, {pipeline_mode = #tpu.pipeline_mode<synchronous>, transform_indices = @transform_6, window_bounds = array<i64: 1, 32>}, {transform_indices = @transform_7, window_bounds = array<i64: 1, 8, 32>}]} {
    %c0 = arith.constant 0 : index
    %c0_0 = arith.constant 0 : index
    %c0_1 = arith.constant 0 : index
    %0 = vector.load %arg2[%c0, %c0_0, %c0_1] : memref<1x8x16xf32, #tpu.memory_space<vmem>>, vector<1x8x16xf32>
    %1 = vector.shape_cast %0 : vector<1x8x16xf32> to vector<8x16xf32>
    %c0_2 = arith.constant 0 : index
    %c0_3 = arith.constant 0 : index
    %2 = vector.load %arg3[%c0_2, %c0_3] : memref<16x32xf32, #tpu.memory_space<vmem>>, vector<16x32xf32>
    %cst = arith.constant dense<0.000000e+00> : vector<8x32xf32>
    %3 = tpu.matmul %1, %2, %cst {dimension_numbers = #tpu.dot_dimension_numbers<[1], [0], [0], [1], [0, 0, 1, 1], [], []>} : vector<8x16xf32>, vector<16x32xf32>, vector<8x32xf32> -> vector<8x32xf32>
    %c0_4 = arith.constant 0 : index
    %c0_5 = arith.constant 0 : index
    %c0_6 = arith.constant 0 : index
    %4 = vector.load %arg6[%c0_4, %c0_5, %c0_6] : memref<1x8x32xf32, #tpu.memory_space<vmem>>, vector<1x8x32xf32>
    %5 = vector.shape_cast %4 : vector<1x8x32xf32> to vector<8x32xf32>
    %6 = arith.addf %3, %5 : vector<8x32xf32>
    %c0_7 = arith.constant 0 : index
    %c0_8 = arith.constant 0 : index
    %c0_9 = arith.constant 0 : index
    %7 = vector.load %arg4[%c0_7, %c0_8, %c0_9] : memref<1x8x1xi32, #tpu.memory_space<vmem>>, vector<1x8x1xi32>
    %8 = vector.shape_cast %7 : vector<1x8x1xi32> to vector<8x1xi32>
    %c0_i32 = arith.constant 0 : i32
    %9 = vector.broadcast %c0_i32 : i32 to vector<8x1xi32>
    %10 = arith.cmpi eq, %8, %9 : vector<8x1xi32>
    %11 = arith.extui %10 : vector<8x1xi1> to vector<8x1xi32>
    %12 = arith.sitofp %11 : vector<8x1xi32> to vector<8x1xf32>
    %c0_10 = arith.constant 0 : index
    %c0_11 = arith.constant 0 : index
    %13 = vector.load %arg5[%c0_10, %c0_11] : memref<2x32xf32, #tpu.memory_space<vmem>>, vector<1x32xf32>
    %14 = vector.broadcast %12 : vector<8x1xf32> to vector<8x32xf32>
    %15 = vector.broadcast %13 : vector<1x32xf32> to vector<8x32xf32>
    %16 = arith.mulf %14, %15 : vector<8x32xf32>
    %17 = arith.addf %6, %16 : vector<8x32xf32>
    %c1_i32 = arith.constant 1 : i32
    %18 = vector.broadcast %c1_i32 : i32 to vector<8x1xi32>
    %19 = arith.cmpi eq, %8, %18 : vector<8x1xi32>
    %20 = arith.extui %19 : vector<8x1xi1> to vector<8x1xi32>
    %21 = arith.sitofp %20 : vector<8x1xi32> to vector<8x1xf32>
    %c1 = arith.constant 1 : index
    %c0_12 = arith.constant 0 : index
    %22 = vector.load %arg5[%c1, %c0_12] : memref<2x32xf32, #tpu.memory_space<vmem>>, vector<1x32xf32>
    %23 = vector.broadcast %21 : vector<8x1xf32> to vector<8x32xf32>
    %24 = vector.broadcast %22 : vector<1x32xf32> to vector<8x32xf32>
    %25 = arith.mulf %23, %24 : vector<8x32xf32>
    %26 = arith.addf %17, %25 : vector<8x32xf32>
    %cst_13 = arith.constant dense<0.000000e+00> : vector<8xf32>
    %27 = vector.multi_reduction <add>, %26, %cst_13 [1] : vector<8x32xf32> to vector<8xf32>
    %28 = vector.shape_cast %27 : vector<8xf32> to vector<8x1xf32>
    %29 = arith.mulf %26, %26 : vector<8x32xf32>
    %cst_14 = arith.constant dense<0.000000e+00> : vector<8xf32>
    %30 = vector.multi_reduction <add>, %29, %cst_14 [1] : vector<8x32xf32> to vector<8xf32>
    %31 = vector.shape_cast %30 : vector<8xf32> to vector<8x1xf32>
    %cst_15 = arith.constant 3.200000e+01 : f32
    %32 = vector.broadcast %cst_15 : f32 to vector<8x1xf32>
    %33 = arith.divf %28, %32 : vector<8x1xf32>
    %cst_16 = arith.constant 3.200000e+01 : f32
    %34 = vector.broadcast %cst_16 : f32 to vector<8x1xf32>
    %35 = arith.divf %31, %34 : vector<8x1xf32>
    %36 = arith.mulf %33, %33 : vector<8x1xf32>
    %37 = arith.subf %35, %36 : vector<8x1xf32>
    %cst_17 = arith.constant 9.99999996E-13 : f32
    %38 = vector.broadcast %cst_17 : f32 to vector<8x1xf32>
    %39 = arith.addf %37, %38 : vector<8x1xf32>
    %40 = math.rsqrt %39 : vector<8x1xf32>
    %41 = vector.broadcast %33 : vector<8x1xf32> to vector<8x32xf32>
    %42 = arith.subf %26, %41 : vector<8x32xf32>
    %43 = vector.broadcast %40 : vector<8x1xf32> to vector<8x32xf32>
    %44 = arith.mulf %42, %43 : vector<8x32xf32>
    %c0_18 = arith.constant 0 : index
    %c0_19 = arith.constant 0 : index
    %45 = vector.load %arg7[%c0_18, %c0_19] : memref<1x32xf32, #tpu.memory_space<vmem>>, vector<1x32xf32>
    %46 = vector.broadcast %45 : vector<1x32xf32> to vector<8x32xf32>
    %47 = arith.mulf %44, %46 : vector<8x32xf32>
    %c0_20 = arith.constant 0 : index
    %c0_21 = arith.constant 0 : index
    %48 = vector.load %arg8[%c0_20, %c0_21] : memref<1x32xf32, #tpu.memory_space<vmem>>, vector<1x32xf32>
    %49 = vector.broadcast %48 : vector<1x32xf32> to vector<8x32xf32>
    %50 = arith.addf %47, %49 : vector<8x32xf32>
    %c0_22 = arith.constant 0 : index
    %c0_23 = arith.constant 0 : index
    %c0_24 = arith.constant 0 : index
    %51 = vector.load %arg9[%c0_22, %c0_23, %c0_24] : memref<1x8x32xf32, #tpu.memory_space<vmem>>, vector<1x8x32xf32>
    %52 = vector.shape_cast %51 : vector<1x8x32xf32> to vector<8x32xf32>
    %53 = vector.shape_cast %50 : vector<8x32xf32> to vector<1x8x32xf32>
    tpu.vector_store %arg9[%c0_22, %c0_23, %c0_24], %53 {strides = array<i32>} : memref<1x8x32xf32, #tpu.memory_space<vmem>>, vector<1x8x32xf32>,
    return
  }
  func.func @transform_0(%arg0: i32, %arg1: i32) -> (i32, i32, i32) {
    %c0_i32 = arith.constant 0 : i32
    %c0_i32_0 = arith.constant 0 : i32
    return %arg0, %arg1, %c0_i32 : i32, i32, i32
  }
  func.func @transform_1(%arg0: i32, %arg1: i32) -> (i32, i32) {
    %c0_i32 = arith.constant 0 : i32
    %c0_i32_0 = arith.constant 0 : i32
    %c0_i32_1 = arith.constant 0 : i32
    return %c0_i32, %c0_i32_0 : i32, i32
  }
  func.func @transform_2(%arg0: i32, %arg1: i32) -> (i32, i32, i32) {
    %c0_i32 = arith.constant 0 : i32
    %c0_i32_0 = arith.constant 0 : i32
    return %arg0, %arg1, %c0_i32 : i32, i32, i32
  }
  func.func @transform_3(%arg0: i32, %arg1: i32) -> (i32, i32) {
    %c0_i32 = arith.constant 0 : i32
    %c0_i32_0 = arith.constant 0 : i32
    %c0_i32_1 = arith.constant 0 : i32
    return %c0_i32, %c0_i32_0 : i32, i32
  }
  func.func @transform_4(%arg0: i32, %arg1: i32) -> (i32, i32, i32) {
    %c0_i32 = arith.constant 0 : i32
    %c0_i32_0 = arith.constant 0 : i32
    %c0_i32_1 = arith.constant 0 : i32
    return %c0_i32, %arg1, %c0_i32_0 : i32, i32, i32
  }
  func.func @transform_5(%arg0: i32, %arg1: i32) -> (i32, i32) {
    %c0_i32 = arith.constant 0 : i32
    %c0_i32_0 = arith.constant 0 : i32
    %c0_i32_1 = arith.constant 0 : i32
    return %c0_i32, %c0_i32_0 : i32, i32
  }
  func.func @transform_6(%arg0: i32, %arg1: i32) -> (i32, i32) {
    %c0_i32 = arith.constant 0 : i32
    %c0_i32_0 = arith.constant 0 : i32
    %c0_i32_1 = arith.constant 0 : i32
    return %c0_i32, %c0_i32_0 : i32, i32
  }
  func.func @transform_7(%arg0: i32, %arg1: i32) -> (i32, i32, i32) {
    %c0_i32 = arith.constant 0 : i32
    %c0_i32_0 = arith.constant 0 : i32
    return %arg0, %arg1, %c0_i32 : i32, i32, i32
  }
}

</mosaic_0001>

<bundles_post_ra>
// kernel: tpu_custom_call.1
= control target key start
LH: loop header
LB: loop body
LE: loop exit
PB: predicated region body
PF: predicated region fallthrough
CT: control target
= control target key end

     0   :  { %12 = vsyncpa [#allocation3], 0  ;;  %s1041_s0 = inlined_call_operand.vmem [shape: f32[2,8,16], index: 0, kind: input, shape index: {}]   ;;  %s1042_s1 = inlined_call_operand.hbm [shape: f32[16,32], index: 1, kind: input, shape index: {}]   ;;  %s1043_s2 = inlined_call_operand.vmem [shape: s32[2,8,1], index: 2, kind: input, shape index: {}]   ;;  %s1044_s3 = inlined_call_operand.vmem [shape: f32[2,32], index: 3, kind: input, shape index: {}]   ;;  %s1045_s4 = inlined_call_operand.hbm [shape: f32[1,8,32], index: 4, kind: input, shape index: {}]   ;;  %s1046_s5 = inlined_call_operand.vmem [shape: f32[1,32], index: 5, kind: input, shape index: {}]   ;;  %s1047_s6 = inlined_call_operand.vmem [shape: f32[1,32], index: 6, kind: input, shape index: {}]   ;;  %s1048_s7 = inlined_call_operand.hbm [shape: f32[2,8,32], index: 7, kind: output, shape index: {}]  }
   0x1   :  { %13 = vsyncpa [#allocation6], 0 }
   0x2   :  { %14 = vsyncpa [#allocation4], 0 }
   0x3   :  { %16 = vsyncpa [#allocation4 + $0x1], 0  ;;  %s898_s24 = smov 0   ;;  %s900_s25 = smov 0  }
   0x4   :  { %s902_s26 = smov 0   ;;  %s904_s27 = smov 0  }
   0x5   :  { %s906_s28 = smov 0   ;;  %s908_s29 = smov 0  }
   0x6 LB: > { %s589_s30 = sadd.s32 4294967295, %s849_s29   ;;  %s590_s8 = sadd.s32 4294967294, %s849_s29   ;;  %s849_s29 = sphi %s908_s29, %s22_s29   ;;  %s845_s28 = sphi %s906_s28, %s1057_s28   ;;  %s841_s27 = sphi %s904_s27, %s1056_s27   ;;  %s837_s26 = sphi %s902_s26, %s1055_s26   ;;  %s833_s25 = sphi %s900_s25, %s1054_s25   ;;  %s829_s24 = sphi %s898_s24, %s1053_s24  }
   0x7   : > { %s34_s9 = sadd.s32 1, %s845_s28  ;;  %s209_s10 = sadd.s32 1, %s837_s26 }
   0x8   : > { %p36_p0 = scmp.ge.s32.totalorder %s34_s9, 2  ;;  %p219_p1 = scmp.ne.s32.totalorder %s837_s26, %s833_s25 }
   0x9   : > { %p220_p2 = scmp.eq.s32.totalorder %s589_s30, 1  ;;  %p225_p3 = scmp.ne.s32.totalorder %s833_s25, %s829_s24 }
   0xa   : > { %s1059_s9 = smov (%p36_p0, %s34_s9), 0  ;;  %p226_p5 = scmp.eq.s32.totalorder %s590_s8, 1 }
   0xb   : > { %p938_p4 = por %p220_p2, %p219_p1  ;;  %s204_s12 = ssub.s32 %s845_s28, %s1059_s9 }
   0xc   : > { %p591_p6 = scmp.ge.s32.totalorder %s849_s29, 1  ;;  %p207_p7 = scmp.eq.s32.totalorder %s204_s12, 0 }
   0xd   : > { %p945_p8 = por %p226_p5, %p225_p3  ;;  %p233_p9 = scmp.lt.s32.totalorder %s849_s29, 3 }
   0xe   : > { %s951_s14 = scalar_select %p207_p7, %s837_s26, %s209_s10  }
   0xf   : > { %p953_p10 = pnand %p591_p6, %p233_p9  ;;  %p957_p11 = scmp.eq.s32.totalorder %s589_s30, 0 }
  0x10   : > { %s244_s19 = sshll.u32 %s1042_s1, 4  ;;  %s851_s20 = smov [#allocation2]   ;;  %s245_s19 = int_to_ptr.hbm [resolvable:$true] %s244_s19 }
  0x11   : > { %p618_p12 = pneg %p953_p10  ;;  %s246_s21 = sshll.u32 %s851_s20, 4  ;;  %s247_s21 = int_to_ptr.vmem [resolvable:$true] %s246_s21 }
  0x12   : > { %s264_s30 = sshll.u32 %s1045_s4, 4  ;;  %s852_s8 = smov 128   ;;  %s265_s30 = int_to_ptr.hbm [resolvable:$true] %s264_s30 }
  0x13   : > { %p619_p13 = pnand %p957_p11, %p618_p12  ;;  %s853_s10 = smov 8  }
  0x14   : > { %s854_s12 = smov [#allocation5]   ;;  %305 = sbr.rel (%p953_p10) target bundleno = 319 (0x13f), region = 48 }
  0x15   : > { %621 = dma.hbm_to_vmem [thread:$0]  (!%p619_p13), %s245_s19, 256, %s247_s21, [#allocation3], %s852_s8, %s852_s8, %s853_s10  }
  0x16   : > { %s266_s17 = sshll.u32 %s854_s12, 4  ;;  %s267_s17 = int_to_ptr.vmem [resolvable:$true] %s266_s17 }
  0x17   : > { %624 = dma.hbm_to_vmem [thread:$0]  (!%p619_p13), %s265_s30, 128, %s267_s17, [#allocation6]  }
  0x19   : > { %816 = dma.done.wait (%p957_p11), [#allocation3], 256  }
  0x1a   : > { %818 = vsyncadd (%p957_p11), [#allocation3], 4294967040 }
  0x1b   : > { %820 = dma.done.wait (%p957_p11), [#allocation6], 128  }
  0x1c   : > { %822 = vsyncadd (%p957_p11), [#allocation6], 4294967168  ;;  %p352_p0 = scmp.lt.s32.totalorder %s841_s27, 1  ;;  %v855_v0 = vmov 0   ;;  %v368_v1 = vld [vmem:[#allocation2 + $0x8] sm:$0xff]  ;;  %v367_v2 = vld [vmem:[#allocation2] sm:$0xff] }
  0x1d   : > { %689 = vset.pattern.permute.xlu0 %v855_v0  ;;  %388 = vmatpush.msra.mxu0 %v368_v1  ;;  %vm370_vm0 = vcmask 130048   ;;  %v856_v5 = vmov 0.0   ;;  %v695_v10 = vld [vmem:[%s1044_s3] ss:$0 sm:$0xff]  ;;  %v369_v12 = vld [vmem:[#allocation5] sm:$0xff]  ;;  %vm419_vm3 = vcmask 261120  }
  0x1e   : > { %s353_s18 = scalar_select %p352_p0, %s841_s27, 1  ;;  %v696_v13 = vld [vmem:[%s1044_s3 + $0x1] ss:$0 sm:$0xff]  ;;  %v857_v24 = vmov 32.0   ;;  %v697_v45 = vld [vmem:[%s1046_s5] ss:$0 sm:$0xff] }
  0x1f   : > { %389 = vmatpush.msra.mxu0 %v367_v2  ;;  %699 = vrcp.f32 %v857_v24  ;;  %s349_s17 = sand.u32 1, %s833_s25   ;;  %v698_v48 = vld [vmem:[%s1047_s6] ss:$0 sm:$0xff] }
  0x20   : > { %s599_s15 = sshll.u32 %s353_s18, 3  ;;  %s598_s18 = sshll.u32 %s349_s17, 3 }
  0x21   : > { %s358_s21 = scalar_lea.vmem %s1041_s0, %s599_s15  ;;  %s365_s30 = scalar_lea.vmem %s1043_s2, %s599_s15 }
  0x22   : > { %v366_v3 = vld [vmem:[%s358_s21] sm:$0xff]  ;;  %s605_s15 = sshll.u32 %s841_s27, 3  ;;  %s351_s27 = scalar_lea.vmem [#allocation7], %s598_s18 }
  0x23   : > { %v394_v4 = vld [vmem:[%s365_s30] sm:$0xff]  ;;  %601 = vmatmul.msk.f32.vlgmr.msra.gmra.mxu0 %vm370_vm0, %v366_v3  ;;  %s474_s23 = scalar_lea.hbm %s1048_s7, %s605_s15  ;;  %s476_s8 = sshll.u32 %s351_s27, 4  ;;  %s477_s8 = int_to_ptr.vmem [resolvable:$true] %s476_s8 }
  0x24   : > { %vm395_vm1 = vcmp.eq.s32.totalorder %v394_v4, 0  ;;  %vm407_vm2 = vcmp.eq.s32.totalorder %v394_v4, 1  ;;  %s478_s10 = sshll.u32 %s474_s23, 4  ;;  %s463_s12 = scalar_lea.sflag [#allocation4], %s349_s17  ;;  %s479_s10 = int_to_ptr.hbm [resolvable:$true] %s478_s10 }
  0x25   : > { %v602_v6 = vsel %vm395_vm1, 1.0, %v856_v5  ;;  %v603_v7 = vsel %vm407_vm2, 1.0, %v856_v5  ;;  %v700_v25 = vpop.eup %699  ;;  %s777_s19 = sshra.s32 %s479_s10, 4  ;;  %s783_s18 = scalar_lea.hbm %s1048_s7, 16  ;;  %s778_s19 = int_to_ptr.hbm [resolvable:$true] %s777_s19 }
  0x26   : > { %v690_v8 = vpack.i.bf16 %v603_v7, %v602_v6  ;;  %v428_v26 = vmul.f32 32.0, %v700_v25  ;;  %vm432_vm4 = vweird.f32 %v700_v25  ;;  %s779_s15 = scalar_lea.hbm %s778_s19, 8  ;;  %p784_p5 = scmp.lt.s32.totalorder %s778_s19, %s1048_s7 }
  0x27   : > { %p780_p1 = scmp.ne.s32.totalorder %s778_s19, %s779_s15  ;;  %p785_p6 = scmp.lt.s32.totalorder %s783_s18, %s779_s15 }
  0x28   : > { %691 = vperm.xlu0 %689, %v690_v8   ;;  %v429_v27 = vsub.f32 1.0, %v428_v26 }
  0x29   : > { %p781_p2 = pnand %p780_p1, %p938_p4  ;;  %p786_p7 = por %p785_p6, %p784_p5 }
  0x2a   : > { %v430_v28 = vmul.f32 %v700_v25, %v429_v27 }
  0x2b   : > { %p782_p3 = pneg %p781_p2 }
  0x2c   : > { %v431_v29 = vadd.f32 %v700_v25, %v430_v28 }
  0x2d   : > { %p787_p9 = pnand %p786_p7, %p782_p3 }
  0x2e   : > { %v433_v30 = vsel %vm432_vm4, %v700_v25, %v431_v29 }
  0x9a   : > { %v692_v9 = vpop.permute.xlu0 %691 }
  0x9b   : > { %v693_v11 = vunpack.i.l.bf16 %v692_v9  ;;  %v694_v14 = vunpack.i.h.bf16 %v692_v9 }
  0x9d   : > { %v405_v15 = vmul.f32 %v695_v10, %v693_v11  ;;  %v417_v18 = vmul.f32 %v696_v13, %v694_v14 }
  0xa0   : > { %v391_v16 = vpop.f32.mrf.mxu0 }
  0xa1   : > { %v392_v17 = vadd.f32 %v391_v16, %v369_v12 }
  0xa3   : > { %v406_v19 = vadd.f32 %v405_v15, %v392_v17 }
  0xa5   : > { %v418_v20 = vadd.f32 %v417_v18, %v406_v19 }
  0xa7   : > { %v420_v21 = vsel %vm419_vm3, %v418_v20, 0.0  ;;  %v423_v22 = vmul.f32 %v418_v20, %v418_v20 }
  0xa8   : > { %421 = vadd.xlane.f32.xlu0 %v420_v21 }
  0xa9   : > { %v424_v23 = vsel %vm419_vm3, %v423_v22, 0.0 }
  0xaa   : > { %425 = vadd.xlane.f32.xlu1 %v424_v23 }
 0x11b   : > { %v422_v31 = vpop.xlane.xlu0 %421 }
 0x11c   : > { %v434_v32 = vmul.f32 %v433_v30, %v422_v31 }
 0x11d   : > { %v426_v33 = vpop.xlane.xlu1 %425 }
 0x11e   : > { %v436_v34 = vmul.f32 %v434_v32, %v434_v32  ;;  %v435_v35 = vmul.f32 %v433_v30, %v426_v33  ;;  %v449_v44 = vsub.f32 %v418_v20, %v434_v32 }
 0x120   : > { %v437_v36 = vsub.f32 %v435_v35, %v436_v34 }
 0x122   : > { %v438_v37 = vadd.f32 1e-12, %v437_v36 }
 0x124   : > { %701 = vrsqrt.f32 %v438_v37  ;;  %vm445_vm6 = vweird.f32 %v438_v37 }
 0x12a   : > { %v702_v38 = vpop.eup %701 }
 0x12b   : > { %v440_v39 = vmul.f32 %v702_v38, %v438_v37  ;;  %vm446_vm5 = vweird.f32 %v702_v38 }
 0x12c   : > { %vm447_vm7 = vmor %vm445_vm6, %vm446_vm5 }
 0x12d   : > { %v441_v40 = vmul.f32 %v702_v38, %v440_v39 }
 0x12f   : > { %v442_v41 = vmul.f32 0.5, %v441_v40 }
 0x131   : > { %v443_v42 = vsub.f32 1.5, %v442_v41 }
 0x133   : > { %v444_v43 = vmul.f32 %v702_v38, %v443_v42 }
 0x135   : > { %v448_v46 = vsel %vm447_vm7, %v702_v38, %v444_v43 }
 0x136   : > { %v450_v47 = vmul.f32 %v449_v44, %v448_v46 }
 0x138   : > { %v455_v49 = vmul.f32 %v697_v45, %v450_v47 }
 0x13a   : > { %v460_v50 = vadd.f32 %v698_v48, %v455_v49 }
 0x13c   : > { %461 = vst.msk [vmem:[%s351_s27] sm:$0xff] %vm419_vm3, %v460_v50 }
 0x13d   : > { %790 = shalt.err (!%p787_p9)
}
 0x13e   : > { %616 = dma.vmem_to_hbm [thread:$0]  (%p938_p4), %s477_s8, 128, %s479_s10, %s463_s12  }
 0x13f PF: > { %p633_p10 = scmp.ge.s32.totalorder %s849_s29, 2  ;;  %s490_s17 = sand.u32 1, %s829_s24  }
 0x140   : > { %s491_s30 = scalar_lea.sflag [#allocation4], %s490_s17 }
 0x141   : > { %p626_p11 = pnand %p633_p10, %p945_p8 }
 0x143   : > { %p627_p12 = pneg %p626_p11 }
 0x145   : > { %824 = dma.done.wait (%p627_p12), %s491_s30, 128  }
 0x146   : > { %826 = vsyncadd (%p627_p12), %s491_s30, 4294967168  ;;  %s22_s29 = sadd.s32 1, %s849_s29   ;;  %s1053_s24 = smov %s833_s25 }
 0x147   : > { %p19_p13 = scmp.ge.s32.totalorder %s22_s29, 4   ;;  %s1054_s25 = smov %s837_s26 }
 0x148   : > { %s1055_s26 = smov %s951_s14  ;;  %s1056_s27 = smov %s845_s28 }
 0x149   : > { %s1057_s28 = smov %s1059_s9  ;;  %21 = sbr.rel (!%p19_p13) target bundleno = 6 (0x6), region = 96 }
 0x14e   :  { %497 = vsyncpa [#allocation3], 1 }
 0x14f   :  { %499 = vsyncpa [#allocation3 + $0x1], 1 }
 0x150   :  { %500 = vsyncpa [#allocation6], 1 }
 0x151   :  { %501 = vsyncpa [#allocation4], 1 }
 0x152   :  { %503 = vsyncpa [#allocation4 + $0x1], 1 }

</bundles_post_ra>
